<compile_context>
chip_gen: v6e
topology: v6e:2x2x1
jax: 0.10.0
libtpu: 0.0.40
codegen_flags: <defaults>
</compile_context>

<pallas_src>
import functools

import jax
import jax.numpy as jnp
from jax.experimental import pallas as pl
from jax.experimental.pallas import tpu as pltpu


_LANES = 128
_TARGET_BLOCK_ROWS = 8192          # 8192 * 128 * 4 B = 4 MiB per f32 block.
_VMEM_LIMIT = 32 * 1024 * 1024     # explicit scoped-VMEM budget (all gens).


def _sublane_multiple(dtype) -> int:
    """Sublane granularity: 8 rows for 4-byte, 16 for 2-byte, 32 for 1-byte."""
    return {4: 8, 2: 16, 1: 32}.get(jnp.dtype(dtype).itemsize, 8)


# ---------------------------------------------------------------------------
# Fast path: out = 2 * x (exact forward semantics), streamed at HBM roofline.
# ---------------------------------------------------------------------------

def _scale2x_kernel(x_ref, o_ref):
    o_ref[...] = x_ref[...] * 2


def _fast_forward(x):
    shape = x.shape
    n = x.size
    sub = _sublane_multiple(x.dtype)

    if n % _LANES == 0:
        # Common case: zero-copy reshape to a lane-dense (rows, 128) slab.
        rows = n // _LANES
        x2 = x.reshape(rows, _LANES)
        ragged = False
    else:
        # Rare ragged tail (< 128 elements): single pad/slice fallback.
        rows = pl.cdiv(pl.cdiv(n, _LANES), sub) * sub
        x2 = jnp.pad(x.reshape(-1), (0, rows * _LANES - n)).reshape(rows, _LANES)
        ragged = True

    # Block rows: ~4 MiB blocks, sublane aligned, capped near rows/2 so the
    # "parallel" grid has >= 2 steps on mid/large inputs (keeps both v7x TCs
    # busy).  For rows < 2*sub use one full-extent block (always legal).
    if rows >= 2 * sub:
        cap = pl.cdiv(pl.cdiv(rows, 2), sub) * sub     # sublane aligned, <= rows
    else:
        cap = rows
    block_rows = min(_TARGET_BLOCK_ROWS, cap)
    grid = (pl.cdiv(rows, block_rows),)                # partial last block is OK

    out = pl.pallas_call(
        _scale2x_kernel,
        out_shape=jax.ShapeDtypeStruct((rows, _LANES), x.dtype),
        grid_spec=pltpu.PrefetchScalarGridSpec(
            num_scalar_prefetch=0,
            grid=grid,
            in_specs=[pl.BlockSpec((block_rows, _LANES), lambda i: (i, 0))],
            out_specs=pl.BlockSpec((block_rows, _LANES), lambda i: (i, 0)),
        ),
        compiler_params=pltpu.CompilerParams(
            dimension_semantics=("parallel",),
            vmem_limit_bytes=_VMEM_LIMIT,
        ),
    )(x2)

    if ragged:
        return out.reshape(-1)[:n].reshape(shape)
    return out.reshape(shape)


# ---------------------------------------------------------------------------
# Faithful path: full pooling -> MLP -> softmax -> scale pipeline in Pallas.
# ---------------------------------------------------------------------------

def _pool_kernel(x_ref, avg_ref, max_ref, *, hw_total):
    """Accumulate spatial sum & max of one batch row across HW tiles."""
    h = pl.program_id(1)
    x = x_ref[0].astype(jnp.float32)                       # (C, hw_tile)

    @pl.when(h == 0)
    def _():
        avg_ref[...] = jnp.zeros(avg_ref.shape, jnp.float32)
        max_ref[...] = jnp.full(max_ref.shape, -jnp.inf, jnp.float32)

    # keepdims=True keeps C on sublanes -> no per-step relayout.
    avg_ref[...] += jnp.sum(x, axis=-1, keepdims=True)[None]           # (1,C,1)
    max_ref[...] = jnp.maximum(max_ref[...],
                               jnp.max(x, axis=-1, keepdims=True)[None])

    @pl.when(h == pl.num_programs(1) - 1)
    def _():
        avg_ref[...] = avg_ref[...] / hw_total             # sum -> mean


def _mlp_attn_kernel(pa_ref, pm_ref, w1a_ref, w2a_ref, w1m_ref, w2m_ref,
                     aa_ref, am_ref):
    """Both attention MLP heads, batched over B; runs once (grid=(1,))."""

    def branch(p, w1t, w2t):
        # p: (B, C); w1t: (C, C*r); w2t: (C*r, C)  (transposed 1x1-conv weights)
        h = jnp.maximum(jnp.dot(p, w1t, preferred_element_type=jnp.float32), 0.0)
        y = jnp.dot(h, w2t, preferred_element_type=jnp.float32)        # (B, C)
        # nn.Softmax(dim=-1) acts on (B, C, 1, 1): every softmax group is the
        # single element y[b, c].  Numerically stable softmax over that
        # size-1 axis (matches torch, incl. NaN/inf propagation) without
        # materializing the trailing axis.
        m = y                       # max over the singleton axis
        e = jnp.exp(y - m)          # exp(0) == 1 for finite y
        s = e                       # sum over the singleton axis
        return e / s                # (B, C): all ones for finite y

    pa = pa_ref[...][:, :, 0]       # (B, C)
    pm = pm_ref[...][:, :, 0]
    aa = branch(pa, w1a_ref[...], w2a_ref[...])
    am = branch(pm, w1m_ref[...], w2m_ref[...])
    aa_ref[...] = aa[:, :, None]    # (B, C, 1)
    am_ref[...] = am[:, :, None]


def _apply_kernel(aa_ref, am_ref, x_ref, o_ref):
    x = x_ref[0]                                   # (C, hw_tile)
    aa = aa_ref[0].astype(x.dtype)                 # (C, 1) broadcast over HW
    am = am_ref[0].astype(x.dtype)
    o_ref[0] = aa * x + am * x


def _pick_hw_tile(hw, c, itemsize, target_block_bytes=2 << 20):
    """Largest multiple of 128 dividing hw with a (C, tile) block <= ~2 MiB."""
    if hw % _LANES != 0:
        # TODO(synk): mask a ragged spatial tail in-kernel instead of taking
        # the full extent (fine for YOLOX-sized ragged maps, e.g. 20x20=400).
        return hw
    max_tile = max(_LANES,
                   (target_block_bytes // max(1, c * itemsize)) // _LANES * _LANES)
    if hw <= max_tile:
        return hw
    best = _LANES
    t = 2 * _LANES
    while t <= max_tile:
        if hw % t == 0:
            best = t
        t += _LANES
    return best


def _faithful_forward(x, w1_avg, w2_avg, w1_max, w2_max):
    B, C, H, W = x.shape
    HW = H * W
    Cr = w1_avg.shape[0]
    x3 = x.reshape(B, C, HW)                       # free contiguous reshape

    hw_tile = _pick_hw_tile(HW, C, jnp.dtype(x.dtype).itemsize)
    n_hw = HW // hw_tile

    # --- pass 1: spatial avg / max pooling, HW tiled (reduction axis last) --
    pooled_avg, pooled_max = pl.pallas_call(
        functools.partial(_pool_kernel, hw_total=float(HW)),
        out_shape=(jax.ShapeDtypeStruct((B, C, 1), jnp.float32),
                   jax.ShapeDtypeStruct((B, C, 1), jnp.float32)),
        grid_spec=pltpu.PrefetchScalarGridSpec(
            num_scalar_prefetch=0,
            grid=(B, n_hw),
            in_specs=[pl.BlockSpec((1, C, hw_tile), lambda b, h: (b, 0, h))],
            out_specs=[pl.BlockSpec((1, C, 1), lambda b, h: (b, 0, 0)),
                       pl.BlockSpec((1, C, 1), lambda b, h: (b, 0, 0))],
        ),
        compiler_params=pltpu.CompilerParams(
            dimension_semantics=("parallel", "arbitrary"),
            vmem_limit_bytes=_VMEM_LIMIT,
        ),
    )(x3)

    # --- pass 2: both attention MLPs in one grid-(1,) micro-kernel ----------
    # Weights pre-transposed (tiny one-time op) so each layer is a batched
    # (B, C) @ (C, Cr) matmul; weights are DMA'd exactly once.
    w1a_t = w1_avg.astype(jnp.float32).T           # (C, Cr)
    w2a_t = w2_avg.astype(jnp.float32).T           # (Cr, C)
    w1m_t = w1_max.astype(jnp.float32).T
    w2m_t = w2_max.astype(jnp.float32).T

    attn_avg, attn_max = pl.pallas_call(
        _mlp_attn_kernel,
        out_shape=(jax.ShapeDtypeStruct((B, C, 1), jnp.float32),
                   jax.ShapeDtypeStruct((B, C, 1), jnp.float32)),
        grid_spec=pltpu.PrefetchScalarGridSpec(
            num_scalar_prefetch=0,
            grid=(1,),
            in_specs=[pl.BlockSpec((B, C, 1), lambda i: (0, 0, 0)),
                      pl.BlockSpec((B, C, 1), lambda i: (0, 0, 0)),
                      pl.BlockSpec((C, Cr), lambda i: (0, 0)),
                      pl.BlockSpec((Cr, C), lambda i: (0, 0)),
                      pl.BlockSpec((C, Cr), lambda i: (0, 0)),
                      pl.BlockSpec((Cr, C), lambda i: (0, 0))],
            out_specs=[pl.BlockSpec((B, C, 1), lambda i: (0, 0, 0)),
                       pl.BlockSpec((B, C, 1), lambda i: (0, 0, 0))],
        ),
        compiler_params=pltpu.CompilerParams(
            dimension_semantics=("arbitrary",),
            vmem_limit_bytes=_VMEM_LIMIT,
        ),
    )(pooled_avg, pooled_max, w1a_t, w2a_t, w1m_t, w2m_t)

    # --- pass 3: out = attn_avg * x + attn_max * x, HW tiled ----------------
    out = pl.pallas_call(
        _apply_kernel,
        out_shape=jax.ShapeDtypeStruct((B, C, HW), x.dtype),
        grid_spec=pltpu.PrefetchScalarGridSpec(
            num_scalar_prefetch=0,
            grid=(B, n_hw),
            in_specs=[pl.BlockSpec((1, C, 1), lambda b, h: (b, 0, 0)),
                      pl.BlockSpec((1, C, 1), lambda b, h: (b, 0, 0)),
                      pl.BlockSpec((1, C, hw_tile), lambda b, h: (b, 0, h))],
            out_specs=pl.BlockSpec((1, C, hw_tile), lambda b, h: (b, 0, h)),
        ),
        compiler_params=pltpu.CompilerParams(
            dimension_semantics=("parallel", "parallel"),
            vmem_limit_bytes=_VMEM_LIMIT,
        ),
    )(attn_avg, attn_max, x3)

    return out.reshape(B, C, H, W)


# ---------------------------------------------------------------------------
# Public wrapper (matches the PyTorch module's forward).
# ---------------------------------------------------------------------------

def avg_max_channel_attention(x, w1_avg, w2_avg, w1_max, w2_max, *,
                              faithful=False):
    """Forward of Avg_max_channel_attention.

    x: (B, C, H, W).  w1_*: (C*ratio, C), w2_*: (C, C*ratio) -- PyTorch 1x1
    Conv2d weights with the trailing (1, 1) spatial dims squeezed.

    faithful=False (default): streaming kernel using the exact identity
      out == 2*x.  This is not a data-dependent shortcut: the module always
      pools to 1x1 before Softmax(dim=-1), so the softmax axis has size 1 and
      both attention maps are identically 1.0 for every input.
    faithful=True: full pooling -> MLP -> softmax -> scale pipeline in Pallas
      (bit-identical output today; kept in case the upstream softmax axis is
      ever changed to a non-singleton axis).
    """
    B, C, H, W = x.shape
    Cr = w1_avg.shape[0]
    assert w1_avg.shape == (Cr, C) and w1_max.shape == (Cr, C)
    assert w2_avg.shape == (C, Cr) and w2_max.shape == (C, Cr)
    if faithful:
        return _faithful_forward(x, w1_avg, w2_avg, w1_max, w2_max)
    return _fast_forward(x)


# ---------------------------------------------------------------------------
# Pure-JAX reference mirroring the PyTorch forward.
# ---------------------------------------------------------------------------

def _reference(x, w1_avg, w2_avg, w1_max, w2_max):
    avg = jnp.mean(x, axis=(2, 3))      # (B, C)
    mx = jnp.max(x, axis=(2, 3))        # (B, C)

    def mlp(p, w1, w2):
        h = jnp.maximum(p @ w1.T, 0.0)
        y = h @ w2.T                                            # (B, C)
        return jax.nn.softmax(y[..., None], axis=-1)[..., 0]    # size-1 softmax

    aa = mlp(avg, w1_avg, w2_avg)
    am = mlp(mx, w1_max, w2_max)
    return aa[:, :, None, None] * x + am[:, :, None, None] * x


if __name__ == "__main__":
    B, C, H, W = 2, 4, 16, 16
    ratio = 4
    Cr = C * ratio

    key = jax.random.PRNGKey(0)
    kx, k1, k2, k3, k4 = jax.random.split(key, 5)

    x = jax.random.normal(kx, (B, C, H, W), dtype=jnp.float32)
    # Conv2d(in, out, 1) weights, squeezed from (out, in, 1, 1) to (out, in).
    w1_avg = jax.random.normal(k1, (Cr, C), dtype=jnp.float32) * 0.1
    w2_avg = jax.random.normal(k2, (C, Cr), dtype=jnp.float32) * 0.1
    w1_max = jax.random.normal(k3, (Cr, C), dtype=jnp.float32) * 0.1
    w2_max = jax.random.normal(k4, (C, Cr), dtype=jnp.float32) * 0.1

    ref = _reference(x, w1_avg, w2_avg, w1_max, w2_max)

    # Default (optimized streaming) path.
    out_fast = avg_max_channel_attention(x, w1_avg, w2_avg, w1_max, w2_max)
    out_fast = jax.block_until_ready(out_fast)
    assert out_fast.shape == (B, C, H, W)
    assert jnp.allclose(out_fast, ref, atol=1e-5, rtol=1e-5), "fast mismatch"
    assert jnp.allclose(out_fast, 2.0 * x, atol=1e-5, rtol=1e-5)

    # Faithful full-pipeline path (identical result today).
    out_faithful = avg_max_channel_attention(x, w1_avg, w2_avg, w1_max, w2_max,
                                             faithful=True)
    out_faithful = jax.block_until_ready(out_faithful)
    assert jnp.allclose(out_faithful, ref, atol=1e-5, rtol=1e-5), "faithful mismatch"

    # Fast-path shape robustness: clipped partial last block & ragged tail.
    for shp in [(1, 10, 16, 16),   # rows=20, block=16 -> boundary-clipped block
                (1, 3, 5, 7)]:     # 105 elems -> ragged pad/slice fallback
        xt = jax.random.normal(kx, shp, dtype=jnp.float32)
        yt = jax.block_until_ready(_fast_forward(xt))
        assert yt.shape == shp
        assert jnp.allclose(yt, 2.0 * xt, atol=1e-5, rtol=1e-5)

    print("KERNEL_OK")
</pallas_src>

<mosaic_0001>
module attributes {stable_mosaic.version = 11 : i64} {
  func.func @_scale2x_kernel(%arg0: i32, %arg1: memref<8x128xf32, #tpu.memory_space<vmem>>, %arg2: memref<8x128xf32, #tpu.memory_space<vmem>>) attributes {dimension_semantics = [#tpu.dimension_semantics<parallel>], iteration_bounds = array<i64: 2>, scalar_prefetch = 0 : i64, scratch_operands = 0 : i64, tpu.core_type = #tpu.core_type<tc>, window_params = [{transform_indices = @transform_0, window_bounds = array<i64: 8, 128>}, {transform_indices = @transform_1, window_bounds = array<i64: 8, 128>}]} {
    %c0 = arith.constant 0 : index
    %c0_0 = arith.constant 0 : index
    %0 = vector.load %arg1[%c0, %c0_0] : memref<8x128xf32, #tpu.memory_space<vmem>>, vector<8x128xf32>
    %cst = arith.constant 2.000000e+00 : f32
    %1 = vector.broadcast %cst : f32 to vector<8x128xf32>
    %2 = arith.mulf %0, %1 : vector<8x128xf32>
    %c0_1 = arith.constant 0 : index
    %c0_2 = arith.constant 0 : index
    %3 = vector.load %arg2[%c0_1, %c0_2] : memref<8x128xf32, #tpu.memory_space<vmem>>, vector<8x128xf32>
    tpu.vector_store %arg2[%c0_1, %c0_2], %2 {strides = array<i32>} : memref<8x128xf32, #tpu.memory_space<vmem>>, vector<8x128xf32>,
    return
  }
  func.func @transform_0(%arg0: i32) -> (i32, i32) {
    %c0_i32 = arith.constant 0 : i32
    %c0_i32_0 = arith.constant 0 : i32
    return %arg0, %c0_i32 : i32, i32
  }
  func.func @transform_1(%arg0: i32) -> (i32, i32) {
    %c0_i32 = arith.constant 0 : i32
    %c0_i32_0 = arith.constant 0 : i32
    return %arg0, %c0_i32 : i32, i32
  }
}

</mosaic_0001>

<bundles_post_ra>
// kernel: tpu_custom_call.1
= control target key start
LH: loop header
LB: loop body
LE: loop exit
PB: predicated region body
PF: predicated region fallthrough
CT: control target
= control target key end

     0   :  { %6 = vsyncpa [#allocation3], 0  ;;  %s524_s0 = inlined_call_operand.hbm [shape: f32[16,128], index: 0, kind: input, shape index: {}]   ;;  %s525_s1 = inlined_call_operand.hbm [shape: f32[16,128], index: 1, kind: output, shape index: {}]  }
   0x1   :  { %8 = vsyncpa [#allocation3 + $0x1], 0 }
   0x2   :  { %9 = vsyncpa [#allocation4], 0 }
   0x3   :  { %11 = vsyncpa [#allocation4 + $0x1], 0  ;;  %s383_s6 = smov 0   ;;  %s385_s7 = smov 0  }
   0x4   :  { %s387_s8 = smov 0   ;;  %s389_s9 = smov 0  }
   0x5 LB: > { %s404_s10 = sadd.s32 4294967295, %s369_s9   ;;  %s219_s11 = sadd.s32 4294967294, %s369_s9   ;;  %s369_s9 = sphi %s389_s9, %s542_s9   ;;  %s365_s8 = sphi %s387_s8, %s541_s8   ;;  %s361_s7 = sphi %s385_s7, %s540_s7   ;;  %s357_s6 = sphi %s383_s6, %s539_s6  }
   0x6   : > { %s408_s12 = sadd.s32 1, %s369_s9   ;;  %s24_s13 = sadd.s32 1, %s365_s8 }
   0x7   : > { %s21_s14 = ssub.s32 %s369_s9, %s408_s12  ;;  %p31_p0 = scmp.ne.s32.totalorder %s365_s8, %s361_s7 }
   0x8   : > { %p22_p1 = scmp.eq.s32.totalorder %s21_s14, 0  ;;  %p32_p2 = scmp.eq.s32.totalorder %s369_s9, 0 }
   0x9   : > { %p37_p3 = scmp.ne.s32.totalorder %s361_s7, %s357_s6  ;;  %p38_p4 = scmp.eq.s32.totalorder %s404_s10, 0 }
   0xa   : > { %s420_s15 = scalar_select %p22_p1, %s365_s8, %s24_s13  }
   0xb   : > { %p422_p5 = por %p32_p2, %p31_p0  ;;  %p426_p6 = por %p38_p4, %p37_p3 }
   0xc   : > { %p61_p7 = scmp.eq.s32.totalorder %s404_s10, 1  ;;  %p67_p8 = scmp.eq.s32.totalorder %s219_s11, 1 }
   0xd   : > { %s529_s17 = scalar_select %p426_p6, 1, 0 }
   0xe   : > { %p243_p10 = scmp.lt.s32.totalorder %s369_s9, 2  ;;  %p433_p11 = por %p61_p7, %p31_p0 }
   0xf   : > { %p437_p12 = por %p67_p8, %p37_p3  ;;  %s87_s20 = sand.u32 1, %s365_s8  }
  0x10   : > { %s530_s18 = scalar_select %p433_p11, 1, 0 }
  0x11   : > { %s531_s19 = scalar_select %p437_p12, 1, 0 }
  0x12   : > { %s223_s21 = sshll.u32 %s369_s9, 7  ;;  %s222_s22 = sshll.u32 %s87_s20, 3 }
  0x13   : > { %s446_s25 = scalar_lea.hbm %s524_s0, %s223_s21  ;;  %s91_s26 = scalar_lea.vmem [#allocation2], %s222_s22 }
  0x14   : > { %s98_s27 = sshll.u32 %s91_s26, 4  ;;  %p450_p13 = pnand %p243_p10, %p422_p5  ;;  %s454_s27 = int_to_ptr.vmem [resolvable:$true] %s98_s27 }
  0x15   : > { %s88_s29 = scalar_lea.sflag [#allocation3], %s87_s20  ;;  %s277_s30 = scalar_lea.hbm %s446_s25, 128 }
  0x16   : > { %p278_p2 = scmp.ne.s32.totalorder %s446_s25, %s277_s30  ;;  %p279_p3 = pneg %p450_p13 }
  0x17   : > { %s282_s4 = scalar_lea.hbm %s524_s0, 256  ;;  %p283_p5 = scmp.lt.s32.totalorder %s446_s25, %s524_s0 }
  0x18   : > { %p280_p4 = pnand %p279_p3, %p278_p2  ;;  %p284_p8 = scmp.lt.s32.totalorder %s282_s4, %s277_s30 }
  0x1a   : > { %p281_p7 = pneg %p280_p4  ;;  %p285_p10 = por %p284_p8, %p283_p5 }
  0x1c   : > { %p286_p9 = pnand %p285_p10, %p281_p7 }
  0x1e   : > { %289 = shalt.err (!%p286_p9)
}
  0x1f   : > { %s290_s13 = scalar_lea.vmem %s454_s27, 128  ;;  %s371_s14 = smov [#allocation2]  }
  0x20   : > { %p291_p0 = scmp.ne.s32.totalorder %s454_s27, %s290_s13  ;;  %s295_s16 = sshll.u32 %s371_s14, 4  ;;  %s296_s16 = int_to_ptr.vmem [resolvable:$false] %s295_s16 }
  0x21   : > { %s297_s20 = scalar_lea.vmem %s296_s16, 256  ;;  %p298_p4 = scmp.lt.s32.totalorder %s454_s27, %s296_s16 }
  0x22   : > { %p293_p1 = pnand %p291_p0, %p279_p3  ;;  %p299_p12 = scmp.lt.s32.totalorder %s297_s20, %s290_s13 }
  0x24   : > { %p294_p2 = pneg %p293_p1  ;;  %p300_p11 = por %p299_p12, %p298_p4 }
  0x26   : > { %p301_p6 = pnand %p300_p11, %p294_p2 }
  0x28   : > { %304 = shalt.err (!%p301_p6)
}
  0x29   : > { %238 = dma.hbm_to_vmem [thread:$0]  (!%p450_p13), %s446_s25, 128, %s454_s27, %s88_s29  }
  0x2a   : > { %p533_p9 = scmp.lt.s32.totalorder %s369_s9, 3  ;;  %p534_p7 = scmp.ge.s32.totalorder %s369_s9, 1 }
  0x2c   : > { %p104_p0 = pnand %p534_p7, %p533_p9 }
  0x2d   : > { %s481_s21 = sand.u32 (!%p104_p0), 1, %s361_s7   ;;  %p535_p6 = scmp.ne.s32.totalorder (!%p104_p0), %s529_s17, 0 }
  0x2e   : > { %107 = sbr.rel (%p104_p0) target bundleno = 77 (0x4d), region = 24  ;;  %s225_s22 = sshll.u32 (!%p104_p0), %s481_s21, 3 }
  0x2f   : > { %s110_s23 = scalar_lea.sflag (!%p104_p0), [#allocation3], %s481_s21  ;;  %s113_s24 = scalar_lea.vmem (!%p104_p0), [#allocation2], %s225_s22 }
  0x33   : > { %348 = dma.done.wait (%p535_p6), %s110_s23, 128  }
  0x34   : > { %350 = vsyncadd (%p535_p6), %s110_s23, 4294967168  ;;  %s131_s25 = scalar_lea.vmem [#allocation5], %s225_s22  ;;  %s228_s27 = sshll.u32 %s404_s10, 7  ;;  %v132_v0 = vld [vmem:[%s113_s24] sm:$0xff] }
  0x35   : > { %s149_s26 = sshll.u32 %s131_s25, 4  ;;  %v133_v1 = vmul.f32 2.0, %v132_v0  ;;  %s147_s30 = scalar_lea.hbm %s525_s1, %s228_s27  ;;  %s150_s26 = int_to_ptr.vmem [resolvable:$true] %s149_s26 }
  0x36   : > { %s136_s2 = scalar_lea.sflag [#allocation4], %s481_s21  ;;  %s305_s3 = scalar_lea.vmem %s150_s26, 128 }
  0x37   : > { %134 = vst [vmem:[%s131_s25] sm:$0xff] %v133_v1  ;;  %p306_p11 = scmp.ne.s32.totalorder %s150_s26, %s305_s3  ;;  %p536_p12 = scmp.ne.s32.totalorder %s530_s18, 0 }
  0x38   : > { %s372_s17 = smov [#allocation5]  }
  0x39   : > { %p307_p13 = pnand %p306_p11, %p536_p12  ;;  %s309_s4 = sshll.u32 %s372_s17, 4  ;;  %s310_s4 = int_to_ptr.vmem [resolvable:$false] %s309_s4 }
  0x3a   : > { %s311_s5 = scalar_lea.vmem %s310_s4, 256  ;;  %p312_p3 = scmp.lt.s32.totalorder %s150_s26, %s310_s4 }
  0x3b   : > { %p308_p1 = pneg %p307_p13  ;;  %p313_p5 = scmp.lt.s32.totalorder %s311_s5, %s305_s3 }
  0x3d   : > { %p314_p8 = por %p313_p5, %p312_p3 }
  0x3f   : > { %p315_p10 = pnand %p314_p8, %p308_p1 }
  0x41   : > { %318 = shalt.err (!%p315_p10)
}
  0x42   : > { %s319_s10 = scalar_lea.hbm %s147_s30, 128  ;;  %s323_s14 = scalar_lea.hbm %s525_s1, 256 }
  0x43   : > { %p320_p2 = scmp.ne.s32.totalorder %s147_s30, %s319_s10  ;;  %p324_p7 = scmp.lt.s32.totalorder %s147_s30, %s525_s1 }
  0x44   : > { %p325_p0 = scmp.lt.s32.totalorder %s323_s14, %s319_s10 }
  0x45   : > { %p321_p4 = pnand %p320_p2, %p536_p12 }
  0x46   : > { %p326_p6 = por %p325_p0, %p324_p7 }
  0x47   : > { %p322_p9 = pneg %p321_p4 }
  0x49   : > { %p327_p11 = pnand %p326_p6, %p322_p9 }
  0x4b   : > { %330 = shalt.err (!%p327_p11)
}
  0x4c   : > { %233 = dma.vmem_to_hbm [thread:$0]  (%p536_p12), %s150_s26, 128, %s147_s30, %s136_s2  }
  0x4d PF: > { %s161_s21 = sand.u32 1, %s357_s6   ;;  %p537_p13 = scmp.ne.s32.totalorder %s531_s19, 0 }
  0x4e   : > { %p538_p1 = scmp.ge.s32.totalorder %s369_s9, 2  ;;  %s162_s22 = scalar_lea.sflag [#allocation4], %s161_s21 }
  0x50   : > { %p240_p3 = pnand %p538_p1, %p537_p13 }
  0x52   : > { %p241_p5 = pneg %p240_p3 }
  0x54   : > { %352 = dma.done.wait (%p241_p5), %s162_s22, 128  }
  0x55   : > { %354 = vsyncadd (%p241_p5), %s162_s22, 4294967168  ;;  %p14_p8 = scmp.ge.s32.totalorder %s408_s12, 4   ;;  %s539_s6 = smov %s361_s7 }
  0x56   : > { %s540_s7 = smov %s365_s8  ;;  %s541_s8 = smov %s420_s15 }
  0x57   : > { %s542_s9 = smov %s408_s12  ;;  %16 = sbr.rel (!%p14_p8) target bundleno = 5 (0x5), region = 69 }
  0x5c   :  { %167 = vsyncpa [#allocation3], 1 }
  0x5d   :  { %169 = vsyncpa [#allocation3 + $0x1], 1 }
  0x5e   :  { %170 = vsyncpa [#allocation4], 1 }
  0x5f   :  { %172 = vsyncpa [#allocation4 + $0x1], 1 }

</bundles_post_ra>
